<compile_context>
chip_gen: v7x
topology: tpu7x:2x2x1
jax: 0.10.0
libtpu: 0.0.40
codegen_flags: <defaults>
</compile_context>

<pallas_src>
import functools

import jax
import jax.numpy as jnp
from jax import lax
from jax.experimental import pallas as pl
from jax.experimental.pallas import tpu as pltpu


def mlp_kernel(x_ref, w1_ref, b1_ref, w2_ref, b2_ref, w3_ref, b3_ref,
               w4_ref, b4_ref, o_ref, *, sub, n_sub):
    # x_ref: (tb, D) f32 batch tile (natural layout); o_ref: (1, tb) f32 lane-dense row.
    def body(j, carry):
        col = j * sub
        if not isinstance(col, int):
            col = pl.multiple_of(col, sub)
        xs = x_ref[pl.ds(col, sub), :]                                   # (sub, D) f32

        # fc1 (f32, tiny K): w1 (128, D) . xs (sub, D) contracted on axis 1 -> (128, sub)
        h = lax.dot_general(w1_ref[...], xs, (((1,), (1,)), ((), ())),
                            preferred_element_type=jnp.float32) + b1_ref[...]
        h = jnp.maximum(h, 0.0)

        # fc2 + ReLU   (dropout is identity at inference)
        h = jnp.dot(w2_ref[...], h.astype(jnp.bfloat16),
                    preferred_element_type=jnp.float32) + b2_ref[...]    # (64, sub)
        h = jnp.maximum(h, 0.0)

        # fc3 + ReLU
        h = jnp.dot(w3_ref[...], h.astype(jnp.bfloat16),
                    preferred_element_type=jnp.float32) + b3_ref[...]    # (32, sub)
        h = jnp.maximum(h, 0.0)

        # fc4: single output row -> VPU multiply + cross-sublane reduce (skip the MXU)
        logits = jnp.sum(w4_ref[...] * h, axis=0, keepdims=True) + b4_ref[...]  # (1, sub)

        o_ref[:, pl.ds(col, sub)] = jax.nn.sigmoid(logits)
        return carry

    lax.fori_loop(0, n_sub, body, 0, unroll=True)


def _round_up(x, m):
    return ((x + m - 1) // m) * m


def _choose_tile(B, D, sub, vmem_budget_bytes=8 << 20, tb_max=1024):
    """Pick a batch-tile width (multiple of `sub`) that is large enough to amortize
    per-step pipeline overhead, fits comfortably in VMEM (double-buffered f32 x tile),
    and leaves >= 2 grid steps for v7x's two TensorCores when the batch allows it."""
    bytes_per_col = 2 * (D + 1) * 4                     # double-buffered f32 x + f32 out
    cap = max(sub, (vmem_budget_bytes // bytes_per_col) // sub * sub)
    tb = min(tb_max, cap, _round_up(B, sub))
    if _round_up(B, tb) == tb and B > sub:              # nb would be 1 -> split the batch
        tb = max(sub, _round_up(pl.cdiv(B, 2), sub))
    return tb


def simple_nn_forward(x, params, *, tb=None, sub=256):
    """x: (B, D) f32; params: PyTorch-layout weights w_i (out,in), biases b_i (out,)."""
    B, D = x.shape
    if tb is None:
        tb = _choose_tile(B, D, sub)
    assert tb % sub == 0 and tb % 128 == 0
    nb = pl.cdiv(B, tb)
    Bp = nb * tb

    # Pad batch to a multiple of the tile; keep natural (Bp, D) layout, f32 (no extra
    # HBM pass for a transpose or cast).
    x_pad = jnp.pad(x, ((0, Bp - B), (0, 0))) if Bp != B else x
    x_pad = x_pad.astype(jnp.float32)

    w1 = params["w1"].astype(jnp.float32)                   # (128, D)  f32 fc1
    w2 = params["w2"].astype(jnp.bfloat16)                  # (64, 128)
    w3 = params["w3"].astype(jnp.bfloat16)                  # (32, 64)
    w4 = params["w4"].reshape(-1, 1).astype(jnp.float32)    # (32, 1)  column for VPU fc4
    b1 = params["b1"].reshape(-1, 1).astype(jnp.float32)    # (128, 1)
    b2 = params["b2"].reshape(-1, 1).astype(jnp.float32)    # (64, 1)
    b3 = params["b3"].reshape(-1, 1).astype(jnp.float32)    # (32, 1)
    b4 = params["b4"].reshape(-1, 1).astype(jnp.float32)    # (1, 1)

    resident = lambda a: pl.BlockSpec(a.shape, lambda i: (0, 0))   # VMEM-resident weights
    kernel = functools.partial(mlp_kernel, sub=sub, n_sub=tb // sub)

    out = pl.pallas_call(
        kernel,
        out_shape=jax.ShapeDtypeStruct((1, Bp), jnp.float32),
        grid=(nb,),
        in_specs=[
            pl.BlockSpec((tb, D), lambda i: (i, 0)),   # x tile: natural layout, streamed
            resident(w1), resident(b1),
            resident(w2), resident(b2),
            resident(w3), resident(b3),
            resident(w4), resident(b4),
        ],
        out_specs=pl.BlockSpec((1, tb), lambda i: (0, i)),   # lane-dense output row
        compiler_params=pltpu.CompilerParams(
            dimension_semantics=("parallel",),
        ),
    )(x_pad, w1, b1, w2, b2, w3, b3, w4, b4)

    return out[0, :B].reshape(B, 1)


def init_params(input_dim, key):
    """PyTorch nn.Linear default init: uniform(+/- 1/sqrt(fan_in)); weight (out,in), bias (out,)."""
    dims = [(input_dim, 128), (128, 64), (64, 32), (32, 1)]
    params = {}
    keys = jax.random.split(key, 2 * len(dims))
    for i, (fan_in, fan_out) in enumerate(dims):
        bound = 1.0 / jnp.sqrt(fan_in)
        params[f"w{i+1}"] = jax.random.uniform(
            keys[2 * i], (fan_out, fan_in), jnp.float32, -bound, bound)
        params[f"b{i+1}"] = jax.random.uniform(
            keys[2 * i + 1], (fan_out,), jnp.float32, -bound, bound)
    return params


def reference_forward(x, params):
    h = jnp.maximum(x @ params["w1"].T + params["b1"], 0.0)
    h = jnp.maximum(h @ params["w2"].T + params["b2"], 0.0)
    h = jnp.maximum(h @ params["w3"].T + params["b3"], 0.0)
    return jax.nn.sigmoid(h @ params["w4"].T + params["b4"])


if __name__ == "__main__":
    key = jax.random.PRNGKey(0)
    k_x, k_p = jax.random.split(key)

    # Non-multiple batch -> exercises padding and the 2-step ("parallel") grid path.
    batch, input_dim = 300, 32
    x = jax.random.normal(k_x, (batch, input_dim), jnp.float32)
    params = init_params(input_dim, k_p)

    out = simple_nn_forward(x, params)
    jax.block_until_ready(out)

    ref = reference_forward(x, params)
    assert out.shape == (batch, 1)
    # Hidden layers use bf16 operands (f32 accumulation) -> loosened tolerance vs f32 ref.
    assert jnp.allclose(out, ref, atol=1e-2, rtol=1e-2)

    print("KERNEL_OK")
</pallas_src>

<mosaic_0001>
module attributes {stable_mosaic.version = 11 : i64} {
  func.func @mlp_kernel(%arg0: i32, %arg1: memref<256x32xf32, #tpu.memory_space<vmem>>, %arg2: memref<128x32xf32, #tpu.memory_space<vmem>>, %arg3: memref<128x1xf32, #tpu.memory_space<vmem>>, %arg4: memref<64x128xbf16, #tpu.memory_space<vmem>>, %arg5: memref<64x1xf32, #tpu.memory_space<vmem>>, %arg6: memref<32x64xbf16, #tpu.memory_space<vmem>>, %arg7: memref<32x1xf32, #tpu.memory_space<vmem>>, %arg8: memref<32x1xf32, #tpu.memory_space<vmem>>, %arg9: memref<1x1xf32, #tpu.memory_space<vmem>>, %arg10: memref<1x256xf32, #tpu.memory_space<vmem>>) attributes {dimension_semantics = [#tpu.dimension_semantics<parallel>], iteration_bounds = array<i64: 2>, scalar_prefetch = 0 : i64, scratch_operands = 0 : i64, tpu.core_type = #tpu.core_type<tc>, window_params = [{transform_indices = @transform_0, window_bounds = array<i64: 256, 32>}, {pipeline_mode = #tpu.pipeline_mode<synchronous>, transform_indices = @transform_1, window_bounds = array<i64: 128, 32>}, {pipeline_mode = #tpu.pipeline_mode<synchronous>, transform_indices = @transform_2, window_bounds = array<i64: 128, 1>}, {pipeline_mode = #tpu.pipeline_mode<synchronous>, transform_indices = @transform_3, window_bounds = array<i64: 64, 128>}, {pipeline_mode = #tpu.pipeline_mode<synchronous>, transform_indices = @transform_4, window_bounds = array<i64: 64, 1>}, {pipeline_mode = #tpu.pipeline_mode<synchronous>, transform_indices = @transform_5, window_bounds = array<i64: 32, 64>}, {pipeline_mode = #tpu.pipeline_mode<synchronous>, transform_indices = @transform_6, window_bounds = array<i64: 32, 1>}, {pipeline_mode = #tpu.pipeline_mode<synchronous>, transform_indices = @transform_7, window_bounds = array<i64: 32, 1>}, {pipeline_mode = #tpu.pipeline_mode<synchronous>, transform_indices = @transform_8, window_bounds = array<i64: 1, 1>}, {transform_indices = @transform_9, window_bounds = array<i64: 1, 256>}]} {
    %c0_i32 = arith.constant 0 : i32
    %c256_i32 = arith.constant 256 : i32
    %0 = arith.muli %c0_i32, %c256_i32 : i32
    %1 = tpu.assume_multiple %0, 256 : i32
    %2 = arith.index_cast %1 : i32 to index
    %c0 = arith.constant 0 : index
    %3 = vector.load %arg1[%2, %c0] : memref<256x32xf32, #tpu.memory_space<vmem>>, vector<256x32xf32>
    %c0_0 = arith.constant 0 : index
    %c0_1 = arith.constant 0 : index
    %4 = vector.load %arg2[%c0_0, %c0_1] : memref<128x32xf32, #tpu.memory_space<vmem>>, vector<128x32xf32>
    %cst = arith.constant dense<0.000000e+00> : vector<128x256xf32>
    %5 = tpu.matmul %4, %3, %cst {dimension_numbers = #tpu.dot_dimension_numbers<[1], [1], [0], [0], [0, 0, 1, 0], [], []>} : vector<128x32xf32>, vector<256x32xf32>, vector<128x256xf32> -> vector<128x256xf32>
    %c0_2 = arith.constant 0 : index
    %c0_3 = arith.constant 0 : index
    %6 = vector.load %arg3[%c0_2, %c0_3] : memref<128x1xf32, #tpu.memory_space<vmem>>, vector<128x1xf32>
    %7 = vector.broadcast %6 : vector<128x1xf32> to vector<128x256xf32>
    %8 = arith.addf %5, %7 : vector<128x256xf32>
    %cst_4 = arith.constant 0.000000e+00 : f32
    %9 = vector.broadcast %cst_4 : f32 to vector<128x256xf32>
    %10 = arith.maximumf %8, %9 : vector<128x256xf32>
    %c0_5 = arith.constant 0 : index
    %c0_6 = arith.constant 0 : index
    %11 = vector.load %arg4[%c0_5, %c0_6] : memref<64x128xbf16, #tpu.memory_space<vmem>>, vector<64x128xbf16>
    %12 = arith.truncf %10 : vector<128x256xf32> to vector<128x256xbf16>
    %cst_7 = arith.constant dense<0.000000e+00> : vector<64x256xf32>
    %13 = tpu.matmul %11, %12, %cst_7 {dimension_numbers = #tpu.dot_dimension_numbers<[1], [0], [0], [1], [0, 0, 1, 1], [], []>} : vector<64x128xbf16>, vector<128x256xbf16>, vector<64x256xf32> -> vector<64x256xf32>
    %c0_8 = arith.constant 0 : index
    %c0_9 = arith.constant 0 : index
    %14 = vector.load %arg5[%c0_8, %c0_9] : memref<64x1xf32, #tpu.memory_space<vmem>>, vector<64x1xf32>
    %15 = vector.broadcast %14 : vector<64x1xf32> to vector<64x256xf32>
    %16 = arith.addf %13, %15 : vector<64x256xf32>
    %cst_10 = arith.constant 0.000000e+00 : f32
    %17 = vector.broadcast %cst_10 : f32 to vector<64x256xf32>
    %18 = arith.maximumf %16, %17 : vector<64x256xf32>
    %c0_11 = arith.constant 0 : index
    %c0_12 = arith.constant 0 : index
    %19 = vector.load %arg6[%c0_11, %c0_12] : memref<32x64xbf16, #tpu.memory_space<vmem>>, vector<32x64xbf16>
    %20 = arith.truncf %18 : vector<64x256xf32> to vector<64x256xbf16>
    %cst_13 = arith.constant dense<0.000000e+00> : vector<32x256xf32>
    %21 = tpu.matmul %19, %20, %cst_13 {dimension_numbers = #tpu.dot_dimension_numbers<[1], [0], [0], [1], [0, 0, 1, 1], [], []>} : vector<32x64xbf16>, vector<64x256xbf16>, vector<32x256xf32> -> vector<32x256xf32>
    %c0_14 = arith.constant 0 : index
    %c0_15 = arith.constant 0 : index
    %22 = vector.load %arg7[%c0_14, %c0_15] : memref<32x1xf32, #tpu.memory_space<vmem>>, vector<32x1xf32>
    %23 = vector.broadcast %22 : vector<32x1xf32> to vector<32x256xf32>
    %24 = arith.addf %21, %23 : vector<32x256xf32>
    %cst_16 = arith.constant 0.000000e+00 : f32
    %25 = vector.broadcast %cst_16 : f32 to vector<32x256xf32>
    %26 = arith.maximumf %24, %25 : vector<32x256xf32>
    %c0_17 = arith.constant 0 : index
    %c0_18 = arith.constant 0 : index
    %27 = vector.load %arg8[%c0_17, %c0_18] : memref<32x1xf32, #tpu.memory_space<vmem>>, vector<32x1xf32>
    %28 = vector.broadcast %27 : vector<32x1xf32> to vector<32x256xf32>
    %29 = arith.mulf %28, %26 : vector<32x256xf32>
    %cst_19 = arith.constant dense<0.000000e+00> : vector<256xf32>
    %30 = vector.multi_reduction <add>, %29, %cst_19 [0] : vector<32x256xf32> to vector<256xf32>
    %31 = vector.shape_cast %30 : vector<256xf32> to vector<1x256xf32>
    %c0_20 = arith.constant 0 : index
    %c0_21 = arith.constant 0 : index
    %32 = vector.load %arg9[%c0_20, %c0_21] : memref<1x1xf32, #tpu.memory_space<vmem>>, vector<1x1xf32>
    %33 = vector.broadcast %32 : vector<1x1xf32> to vector<1x256xf32>
    %34 = arith.addf %31, %33 : vector<1x256xf32>
    %35 = arith.negf %34 : vector<1x256xf32>
    %36 = math.exp %35 : vector<1x256xf32>
    %cst_22 = arith.constant 1.000000e+00 : f32
    %37 = vector.broadcast %cst_22 : f32 to vector<1x256xf32>
    %38 = arith.addf %37, %36 : vector<1x256xf32>
    %39 = arith.divf %37, %38 : vector<1x256xf32>
    %c0_23 = arith.constant 0 : index
    %40 = arith.index_cast %1 : i32 to index
    %41 = vector.load %arg10[%c0_23, %40] : memref<1x256xf32, #tpu.memory_space<vmem>>, vector<1x256xf32>
    tpu.vector_store %arg10[%c0_23, %40], %39 {strides = array<i32>} : memref<1x256xf32, #tpu.memory_space<vmem>>, vector<1x256xf32>,
    %c1_i32 = arith.constant 1 : i32
    return
  }
  func.func @transform_0(%arg0: i32) -> (i32, i32) {
    %c0_i32 = arith.constant 0 : i32
    %c0_i32_0 = arith.constant 0 : i32
    return %arg0, %c0_i32 : i32, i32
  }
  func.func @transform_1(%arg0: i32) -> (i32, i32) {
    %c0_i32 = arith.constant 0 : i32
    %c0_i32_0 = arith.constant 0 : i32
    %c0_i32_1 = arith.constant 0 : i32
    return %c0_i32, %c0_i32_0 : i32, i32
  }
  func.func @transform_2(%arg0: i32) -> (i32, i32) {
    %c0_i32 = arith.constant 0 : i32
    %c0_i32_0 = arith.constant 0 : i32
    %c0_i32_1 = arith.constant 0 : i32
    return %c0_i32, %c0_i32_0 : i32, i32
  }
  func.func @transform_3(%arg0: i32) -> (i32, i32) {
    %c0_i32 = arith.constant 0 : i32
    %c0_i32_0 = arith.constant 0 : i32
    %c0_i32_1 = arith.constant 0 : i32
    return %c0_i32, %c0_i32_0 : i32, i32
  }
  func.func @transform_4(%arg0: i32) -> (i32, i32) {
    %c0_i32 = arith.constant 0 : i32
    %c0_i32_0 = arith.constant 0 : i32
    %c0_i32_1 = arith.constant 0 : i32
    return %c0_i32, %c0_i32_0 : i32, i32
  }
  func.func @transform_5(%arg0: i32) -> (i32, i32) {
    %c0_i32 = arith.constant 0 : i32
    %c0_i32_0 = arith.constant 0 : i32
    %c0_i32_1 = arith.constant 0 : i32
    return %c0_i32, %c0_i32_0 : i32, i32
  }
  func.func @transform_6(%arg0: i32) -> (i32, i32) {
    %c0_i32 = arith.constant 0 : i32
    %c0_i32_0 = arith.constant 0 : i32
    %c0_i32_1 = arith.constant 0 : i32
    return %c0_i32, %c0_i32_0 : i32, i32
  }
  func.func @transform_7(%arg0: i32) -> (i32, i32) {
    %c0_i32 = arith.constant 0 : i32
    %c0_i32_0 = arith.constant 0 : i32
    %c0_i32_1 = arith.constant 0 : i32
    return %c0_i32, %c0_i32_0 : i32, i32
  }
  func.func @transform_8(%arg0: i32) -> (i32, i32) {
    %c0_i32 = arith.constant 0 : i32
    %c0_i32_0 = arith.constant 0 : i32
    %c0_i32_1 = arith.constant 0 : i32
    return %c0_i32, %c0_i32_0 : i32, i32
  }
  func.func @transform_9(%arg0: i32) -> (i32, i32) {
    %c0_i32 = arith.constant 0 : i32
    %c0_i32_0 = arith.constant 0 : i32
    return %c0_i32, %arg0 : i32, i32
  }
}

</mosaic_0001>

<bundles_post_ra>
// kernel: tpu_custom_call.1
= control target key start
LH: loop header
LB: loop body
LE: loop exit
PB: predicated region body
PF: predicated region fallthrough
CT: control target
= control target key end

     0   :  { %s2026_s0 = inlined_call_operand.vmem [shape: f32[512,32], index: 0, kind: input, shape index: {}]   ;;  %s2027_s1 = inlined_call_operand.vmem [shape: f32[128,32], index: 1, kind: input, shape index: {}]   ;;  %s2028_s2 = inlined_call_operand.vmem [shape: f32[128,1], index: 2, kind: input, shape index: {}]   ;;  %s2029_s3 = inlined_call_operand.vmem [shape: bf16[64,128], index: 3, kind: input, shape index: {}]   ;;  %s2030_s4 = inlined_call_operand.vmem [shape: f32[64,1], index: 4, kind: input, shape index: {}]   ;;  %s2031_s5 = inlined_call_operand.vmem [shape: bf16[32,64], index: 5, kind: input, shape index: {}]   ;;  %s2032_s6 = inlined_call_operand.vmem [shape: f32[32,1], index: 6, kind: input, shape index: {}]   ;;  %s2033_s7 = inlined_call_operand.vmem [shape: f32[32,1], index: 7, kind: input, shape index: {}]   ;;  %s2034_s8 = inlined_call_operand.<no memory space> [shape: f32[1,1], index: 8, kind: input, shape index: {}]   ;;  %s2035_s9 = inlined_call_operand.hbm [shape: f32[1,512], index: 9, kind: output, shape index: {}]  }
   0x1   :  { %v14_v0 = vstv %s2034_s8 }
   0x2   :  { %15 = vst [vmem:[#allocation2] sm:$0x1] %v14_v0 }
   0x3   :  { %16 = vsyncpa [#allocation4], 0 }
   0x4   :  { %18 = vsyncpa [#allocation4 + $0x1], 0  ;;  %s1649_s11 = smov 0   ;;  %s1651_s12 = smov 0  }
   0x5   :  { %s1653_s13 = smov 0   ;;  %s1655_s14 = smov 0  }
   0x6 LB: > { %s1288_s8 = sadd.s32 4294967295, %s1591_s14   ;;  %s1289_s15 = sadd.s32 4294967294, %s1591_s14   ;;  %s1591_s14 = sphi %s1655_s14, %s2043_s14   ;;  %s1587_s13 = sphi %s1653_s13, %s2042_s13   ;;  %s1583_s12 = sphi %s1651_s12, %s2041_s12   ;;  %s1579_s11 = sphi %s1649_s11, %s2040_s11  }
   0x7   : > { %s1672_s16 = sadd.s32 1, %s1591_s14   ;;  %s225_s17 = sadd.s32 1, %s1587_s13 }
   0x8   : > { %s222_s18 = ssub.s32 %s1591_s14, %s1672_s16  ;;  %p235_p0 = scmp.ne.s32.totalorder %s1587_s13, %s1583_s12 }
   0x9   : > { %p223_p1 = scmp.eq.s32.totalorder %s222_s18, 0  ;;  %p236_p2 = scmp.eq.s32.totalorder %s1288_s8, 1 }
   0xa   : > { %p241_p3 = scmp.ne.s32.totalorder %s1583_s12, %s1579_s11  ;;  %p242_p4 = scmp.eq.s32.totalorder %s1289_s15, 1 }
   0xb   : > { %s1682_s19 = scalar_select %p223_p1, %s1587_s13, %s225_s17  }
   0xc   : > { %p1684_p5 = por %p236_p2, %p235_p0  ;;  %p1688_p6 = por %p242_p4, %p241_p3 }
   0xd   : > { %p1292_p7 = scmp.ge.s32.totalorder %s1591_s14, 1  ;;  %p293_p8 = scmp.lt.s32.totalorder %s1591_s14, 3 }
   0xf   : > { %p294_p9 = pnand %p1292_p7, %p293_p8 }
  0x10   : > { %s1694_s22 = sshll.u32 (!%p294_p9), %s1288_s8, 5  ;;  %vm481_vm0 = vcmask (!%p294_p9), 261120   ;;  %v1699_v1 = vld [vmem:[%s2027_s1] sm:$0xff] (!%p294_p9)  ;;  %v1593_v2 = vmov (!%p294_p9), 0   ;;  %v386_v5 = vld [vmem:[%s2028_s2 + $0x8] sm:$0xff] (!%p294_p9)  ;;  %v387_v6 = vld [vmem:[%s2028_s2 + $0x10] sm:$0xff] (!%p294_p9) }
  0x11   : > { %297 = sbr.rel (%p294_p9) target bundleno = 918 (0x396), region = 56  ;;  %p330_p10 = scmp.lt.s32.totalorder (!%p294_p9), %s1694_s22, 63  ;;  %1392 = vmatprep.mubr.msk.f32.mxu0 (!%p294_p9), %vm481_vm0, %v1699_v1  ;;  %1513 = vset.pattern.permute.xlu0 (!%p294_p9), %v1593_v2  ;;  %v385_v3 = vld [vmem:[%s2028_s2] sm:$0xff] (!%p294_p9)  ;;  %vm1718_vm1 = vmpackc.low (!%p294_p9), %vm481_vm0, %vm481_vm0  ;;  %v388_v23 = vld [vmem:[%s2028_s2 + $0x18] sm:$0xff] (!%p294_p9)  ;;  %vm1050_vm2 = vcmask (!%p294_p9), 523264  }
  0x12   : > { %1514 = vset.pattern.permute.xlu1 (!%p294_p9), %v1593_v2  ;;  %947 = vmatprep.mubr.bf16.mxu1 (!%p294_p9), %v1593_v2  ;;  %v389_v16 = vld [vmem:[%s2028_s2 + $0x20] sm:$0xff] (!%p294_p9)  ;;  %v391_v24 = vld [vmem:[%s2028_s2 + $0x30] sm:$0xff] (!%p294_p9)  ;;  %v390_v25 = vld [vmem:[%s2028_s2 + $0x28] sm:$0xff] (!%p294_p9)  ;;  %s326_s23 = sand.u32 (!%p294_p9), 1, %s1583_s12   ;;  %s1595_s8 = smov (!%p294_p9), [#allocation3]  }
  0x13   : > { %403 = vperm.xlu0 (!%p294_p9), %1513, %v385_v3   ;;  %413 = vperm.xlu1 (!%p294_p9), %1514, %v387_v6   ;;  %v393_v28 = vld [vmem:[%s2028_s2 + $0x40] sm:$0xff] (!%p294_p9)  ;;  %v392_v32 = vld [vmem:[%s2028_s2 + $0x38] sm:$0xff] (!%p294_p9)  ;;  %v395_v34 = vld [vmem:[%s2028_s2 + $0x50] sm:$0xff] (!%p294_p9)  ;;  %s1293_s24 = sshll.u32 (!%p294_p9), %s326_s23, 1  ;;  %s1216_s29 = scalar_lea.sflag (!%p294_p9), [#allocation4], %s326_s23 }
  0x14   : > { %v394_v37 = vld [vmem:[%s2028_s2 + $0x48] sm:$0xff] (!%p294_p9)  ;;  %v397_v40 = vld [vmem:[%s2028_s2 + $0x60] sm:$0xff] (!%p294_p9)  ;;  %v396_v42 = vld [vmem:[%s2028_s2 + $0x58] sm:$0xff] (!%p294_p9)  ;;  %s1533_s15 = sshll.u32 (!%p294_p9), %s1595_s8, 4  ;;  %s1534_s15 = int_to_ptr.vmem [resolvable:$false] %s1533_s15 }
  0x15   : > { %v399_v44 = vld [vmem:[%s2028_s2 + $0x70] sm:$0xff] (!%p294_p9)  ;;  %v398_v45 = vld [vmem:[%s2028_s2 + $0x68] sm:$0xff] (!%p294_p9)  ;;  %v843_v48 = vld [vmem:[%s2030_s4] sm:$0xff] (!%p294_p9)  ;;  %s1535_s17 = scalar_lea.vmem (!%p294_p9), %s1534_s15, 64 }
  0x16   : > { %v400_v52 = vld [vmem:[%s2028_s2 + $0x78] sm:$0xff] (!%p294_p9)  ;;  %v845_v54 = vld [vmem:[%s2030_s4 + $0x10] sm:$0xff] (!%p294_p9)  ;;  %v844_v55 = vld [vmem:[%s2030_s4 + $0x8] sm:$0xff] (!%p294_p9) }
  0x17   : > { %408 = vperm.xlu0 (!%p294_p9), %1513, %v386_v5   ;;  %418 = vperm.xlu1 (!%p294_p9), %1514, %v388_v23   ;;  %v847_v58 = vld [vmem:[%s2030_s4 + $0x20] sm:$0xff] (!%p294_p9)  ;;  %v846_v62 = vld [vmem:[%s2030_s4 + $0x18] sm:$0xff] (!%p294_p9)  ;;  %v849_v0 = vld [vmem:[%s2030_s4 + $0x30] sm:$0xff] (!%p294_p9) }
  0x18   : > { %s331_s25 = scalar_select %p330_p10, %s1694_s22, 63  ;;  %v848_v3 = vld [vmem:[%s2030_s4 + $0x28] sm:$0xff]  ;;  %v1121_v23 = vld [vmem:[%s2033_s7 + $0x18] sm:$0xff]  ;;  %v371_v4 = vld [vmem:[%s2027_s1 + $0x10] sm:$0xff] }
  0x1a   : > { %s1295_s28 = sshll.u32 %s331_s25, 3  ;;  %s328_s25 = scalar_lea.vmem [#allocation3], %s1293_s24 }
  0x1b   : > { %s1714_s10 = scalar_lea.vmem %s2026_s0, %s1295_s28  ;;  %423 = vperm.xlu0 %1513, %v389_v16   ;;  %428 = vperm.xlu1 %1514, %v390_v25   ;;  %v372_v25 = vld [vmem:[%s2027_s1 + $0x18] sm:$0xff]  ;;  %s1230_s26 = sshll.u32 %s328_s25, 4  ;;  %s1986_s26 = int_to_ptr.vmem [resolvable:$true] %s1230_s26 }
  0x1c   : > { %v353_v7 = vld [vmem:[%s1714_s10 + $0x80] sm:$0xff]  ;;  %v354_v8 = vld [vmem:[%s1714_s10 + $0x88] sm:$0xff]  ;;  %v355_v12 = vld [vmem:[%s1714_s10 + $0x90] sm:$0xff]  ;;  %s1529_s30 = scalar_lea.vmem %s1986_s26, 32  ;;  %p1536_p0 = scmp.lt.s32.totalorder %s1986_s26, %s1534_s15 }
  0x1d   : > { %v337_v9 = vld [vmem:[%s1714_s10] sm:$0xff]  ;;  %v1424_v10 = vpack.c.bf16 %v354_v8, %v353_v7  ;;  %v338_v11 = vld [vmem:[%s1714_s10 + $0x8] sm:$0xff]  ;;  %v356_v13 = vld [vmem:[%s1714_s10 + $0x98] sm:$0xff]  ;;  %p1530_p11 = scmp.ne.s32.totalorder %s1986_s26, %s1529_s30  ;;  %p1537_p1 = scmp.lt.s32.totalorder %s1535_s17, %s1529_s30 }
  0x1e   : > { %v1427_v14 = vpack.c.bf16 %v338_v11, %v337_v9  ;;  %v1430_v15 = vpack.c.bf16 %v356_v13, %v355_v12  ;;  %v339_v17 = vld [vmem:[%s1714_s10 + $0x10] sm:$0xff]  ;;  %v340_v18 = vld [vmem:[%s1714_s10 + $0x18] sm:$0xff]  ;;  %v357_v19 = vld [vmem:[%s1714_s10 + $0xa0] sm:$0xff] }
  0x1f   : > { %1426 = vmatprep.subr.msk.bf16.mxu0 %vm1718_vm1, %v1424_v10  ;;  %v358_v20 = vld [vmem:[%s1714_s10 + $0xa8] sm:$0xff]  ;;  %v1433_v21 = vpack.c.bf16 %v340_v18, %v339_v17  ;;  %433 = vperm.xlu0 %1513, %v391_v24   ;;  %v341_v26 = vld [vmem:[%s1714_s10 + $0x20] sm:$0xff]  ;;  %v359_v29 = vld [vmem:[%s1714_s10 + $0xb0] sm:$0xff]  ;;  %p1531_p12 = pnand %p1530_p11, %p1684_p5  ;;  %p1538_p2 = por %p1537_p1, %p1536_p0 }
  0x20   : > { %1429 = vmatpush3.bf16.xpose.msk.msra.mxu0 %vm1718_vm1, %v1427_v14  ;;  %v1436_v22 = vpack.c.bf16 %v358_v20, %v357_v19  ;;  %v342_v27 = vld [vmem:[%s1714_s10 + $0x28] sm:$0xff]  ;;  %v360_v30 = vld [vmem:[%s1714_s10 + $0xb8] sm:$0xff]  ;;  %v343_v35 = vld [vmem:[%s1714_s10 + $0x30] sm:$0xff]  ;;  %438 = vperm.xlu1 %1514, %v392_v32  }
  0x21   : > { %1432 = vmatprep.subr.msk.bf16.mxu0 %vm1718_vm1, %v1430_v15  ;;  %v1439_v31 = vpack.c.bf16 %v342_v27, %v341_v26  ;;  %v1442_v33 = vpack.c.bf16 %v360_v30, %v359_v29  ;;  %v344_v36 = vld [vmem:[%s1714_s10 + $0x38] sm:$0xff]  ;;  %v361_v38 = vld [vmem:[%s1714_s10 + $0xc0] sm:$0xff]  ;;  %v362_v39 = vld [vmem:[%s1714_s10 + $0xc8] sm:$0xff]  ;;  %p1532_p13 = pneg %p1531_p12 }
  0x22   : > { %v1445_v41 = vpack.c.bf16 %v344_v36, %v343_v35  ;;  %v1448_v43 = vpack.c.bf16 %v362_v39, %v361_v38  ;;  %v345_v46 = vld [vmem:[%s1714_s10 + $0x40] sm:$0xff]  ;;  %v346_v47 = vld [vmem:[%s1714_s10 + $0x48] sm:$0xff]  ;;  %v363_v49 = vld [vmem:[%s1714_s10 + $0xd0] sm:$0xff] }
  0x23   : > { %443 = vperm.xlu0 %1513, %v393_v28   ;;  %v364_v50 = vld [vmem:[%s1714_s10 + $0xd8] sm:$0xff]  ;;  %v1451_v51 = vpack.c.bf16 %v346_v47, %v345_v46  ;;  %v347_v56 = vld [vmem:[%s1714_s10 + $0x50] sm:$0xff]  ;;  %v365_v59 = vld [vmem:[%s1714_s10 + $0xe0] sm:$0xff]  ;;  %p1539_p3 = pnand %p1538_p2, %p1532_p13 }
  0x24   : > { %448 = vperm.xlu1 %1514, %v394_v37   ;;  %v1454_v53 = vpack.c.bf16 %v364_v50, %v363_v49  ;;  %v348_v57 = vld [vmem:[%s1714_s10 + $0x58] sm:$0xff]  ;;  %v366_v60 = vld [vmem:[%s1714_s10 + $0xe8] sm:$0xff]  ;;  %v349_v5 = vld [vmem:[%s1714_s10 + $0x60] sm:$0xff] }
  0x25   : > { %v1457_v61 = vpack.c.bf16 %v348_v57, %v347_v56  ;;  %v1460_v63 = vpack.c.bf16 %v366_v60, %v365_v59  ;;  %v350_v6 = vld [vmem:[%s1714_s10 + $0x68] sm:$0xff]  ;;  %v1016_v7 = vld [vmem:[%s2032_s6] sm:$0xff]  ;;  %v367_v8 = vld [vmem:[%s1714_s10 + $0xf0] sm:$0xff] }
  0x26   : > { %v368_v9 = vld [vmem:[%s1714_s10 + $0xf8] sm:$0xff]  ;;  %v1463_v10 = vpack.c.bf16 %v350_v6, %v349_v5  ;;  %v1018_v13 = vld [vmem:[%s2032_s6 + $0x10] sm:$0xff]  ;;  %v1017_v14 = vld [vmem:[%s2032_s6 + $0x8] sm:$0xff] }
  0x27   : > { %453 = vperm.xlu0 %1513, %v395_v34   ;;  %v850_v11 = vld [vmem:[%s2030_s4 + $0x38] sm:$0xff]  ;;  %v1466_v12 = vpack.c.bf16 %v368_v9, %v367_v8  ;;  %v351_v15 = vld [vmem:[%s1714_s10 + $0x70] sm:$0xff]  ;;  %v1118_v17 = vld [vmem:[%s2033_s7] sm:$0xff] }
  0x28   : > { %1435 = vmatpush3.bf16.xpose.msk.msra.mxu0 %vm1718_vm1, %v1433_v21  ;;  %458 = vperm.xlu1 %1514, %v396_v42   ;;  %v352_v16 = vld [vmem:[%s1714_s10 + $0x78] sm:$0xff]  ;;  %v1120_v20 = vld [vmem:[%s2033_s7 + $0x10] sm:$0xff]  ;;  %v1119_v21 = vld [vmem:[%s2033_s7 + $0x8] sm:$0xff]  ;;  %s1984_s10 = scalar_lea.hbm %s2035_s9, %s1694_s22 }
  0x29   : > { %1438 = vmatprep.subr.msk.bf16.mxu0 %vm1718_vm1, %v1436_v22  ;;  %v1469_v18 = vpack.c.bf16 %v352_v16, %v351_v15  ;;  %v1019_v19 = vld [vmem:[%s2032_s6 + $0x18] sm:$0xff]  ;;  %v1168_v22 = vld [vmem:[#allocation2] sm:$0x1]  ;;  %v370_v24 = vld [vmem:[%s2027_s1 + $0x8] sm:$0xff] }
  0x2a   : > { %v374_v26 = vld [vmem:[%s2027_s1 + $0x28] sm:$0xff]  ;;  %v375_v27 = vld [vmem:[%s2027_s1 + $0x30] sm:$0xff]  ;;  %v376_v28 = vld [vmem:[%s2027_s1 + $0x38] sm:$0xff] }
  0x2b   : > { %463 = vperm.xlu0 %1513, %v397_v40   ;;  %v377_v29 = vld [vmem:[%s2027_s1 + $0x40] sm:$0xff]  ;;  %v378_v30 = vld [vmem:[%s2027_s1 + $0x48] sm:$0xff]  ;;  %v380_v32 = vld [vmem:[%s2027_s1 + $0x58] sm:$0xff] }
  0x2c   : > { %468 = vperm.xlu1 %1514, %v398_v45   ;;  %v382_v34 = vld [vmem:[%s2027_s1 + $0x68] sm:$0xff]  ;;  %v383_v35 = vld [vmem:[%s2027_s1 + $0x70] sm:$0xff]  ;;  %v384_v36 = vld [vmem:[%s2027_s1 + $0x78] sm:$0xff] }
  0x2f   : > { %473 = vperm.xlu0 %1513, %v399_v44  }
  0x30   : > { %1441 = vmatpush3.bf16.xpose.msk.msra.mxu0 %vm1718_vm1, %v1439_v31  ;;  %478 = vperm.xlu1 %1514, %v400_v52   ;;  %v379_v31 = vld [vmem:[%s2027_s1 + $0x50] sm:$0xff] }
  0x31   : > { %1444 = vmatprep.subr.msk.bf16.mxu0 %vm1718_vm1, %v1442_v33  ;;  %v381_v33 = vld [vmem:[%s2027_s1 + $0x60] sm:$0xff] }
  0x33   : > { %853 = vperm.xlu0 %1513, %v843_v48  }
  0x34   : > { %858 = vperm.xlu1 %1514, %v844_v55  }
  0x37   : > { %863 = vperm.xlu0 %1513, %v845_v54  }
  0x38   : > { %1447 = vmatpush3.bf16.xpose.msk.msra.mxu0 %vm1718_vm1, %v1445_v41  ;;  %868 = vperm.xlu1 %1514, %v846_v62  }
  0x39   : > { %1450 = vmatprep.subr.msk.bf16.mxu0 %vm1718_vm1, %v1448_v43 }
  0x3b   : > { %873 = vperm.xlu0 %1513, %v847_v58  }
  0x3c   : > { %878 = vperm.xlu1 %1514, %v848_v3  }
  0x3f   : > { %883 = vperm.xlu0 %1513, %v849_v0  }
  0x40   : > { %1453 = vmatpush3.bf16.xpose.msk.msra.mxu0 %vm1718_vm1, %v1451_v51  ;;  %888 = vperm.xlu1 %1514, %v850_v11  }
  0x41   : > { %1456 = vmatprep.subr.msk.bf16.mxu0 %vm1718_vm1, %v1454_v53 }
  0x43   : > { %1022 = vperm.xlu0 %1513, %v1016_v7  }
  0x44   : > { %1027 = vperm.xlu1 %1514, %v1017_v14  }
  0x47   : > { %1032 = vperm.xlu0 %1513, %v1018_v13  }
  0x48   : > { %1459 = vmatpush3.bf16.xpose.msk.msra.mxu0 %vm1718_vm1, %v1457_v61  ;;  %1037 = vperm.xlu1 %1514, %v1019_v19  }
  0x49   : > { %1462 = vmatprep.subr.msk.bf16.mxu0 %vm1718_vm1, %v1460_v63 }
  0x4b   : > { %1124 = vperm.xlu0 %1513, %v1118_v17  }
  0x4c   : > { %1129 = vperm.xlu1 %1514, %v1119_v21  }
  0x4f   : > { %1134 = vperm.xlu0 %1513, %v1120_v20  }
  0x50   : > { %1465 = vmatpush3.bf16.xpose.msk.msra.mxu0 %vm1718_vm1, %v1463_v10  ;;  %1139 = vperm.xlu1 %1514, %v1121_v23  }
  0x51   : > { %1468 = vmatprep.subr.msk.bf16.mxu0 %vm1718_vm1, %v1466_v12 }
  0x53   : > { %1171 = vperm.xlu0 %1513, %v1168_v22  }
  0x58   : > { %1471 = vmatpush3.bf16.xpose.msk.msra.mxu0 %vm1718_vm1, %v1469_v18 }
  0x5f   : > { %1393 = vmatmul.mubr.msk.f32.vlgmr.msra.gmra.mrb[0].mxu0 %vm481_vm0, %v1699_v1  ;;  %v373_v1 = vld [vmem:[%s2027_s1 + $0x20] sm:$0xff] }
  0x60   : > { %1394 = vmatprep.mubr.msk.f32.mxu0 %vm481_vm0, %v370_v24 }
  0x63   : > { %1395 = vmatmul.mubr.msk.f32.gmra.mrb[2].mxu0 %vm481_vm0, %v370_v24 }
  0x64   : > { %1396 = vmatprep.mubr.msk.f32.mxu0 %vm481_vm0, %v371_v4 }
  0x67   : > { %1397 = vmatmul.mubr.msk.f32.gmra.mrb[4].mxu0 %vm481_vm0, %v371_v4 }
  0x68   : > { %1398 = vmatprep.mubr.msk.f32.mxu0 %vm481_vm0, %v372_v25 }
  0x6b   : > { %1399 = vmatmul.mubr.msk.f32.gmra.mrb[6].mxu0 %vm481_vm0, %v372_v25 }
  0x6c   : > { %1400 = vmatprep.mubr.msk.f32.mxu0 %vm481_vm0, %v373_v1 }
  0x6f   : > { %1401 = vmatmul.mubr.msk.f32.gmra.mrb[8].mxu0 %vm481_vm0, %v373_v1 }
  0x70   : > { %1402 = vmatprep.mubr.msk.f32.mxu0 %vm481_vm0, %v374_v26 }
  0x73   : > { %1403 = vmatmul.mubr.msk.f32.gmra.mrb[10].mxu0 %vm481_vm0, %v374_v26 }
  0x74   : > { %1404 = vmatprep.mubr.msk.f32.mxu0 %vm481_vm0, %v375_v27 }
  0x77   : > { %1405 = vmatmul.mubr.msk.f32.gmra.mrb[12].mxu0 %vm481_vm0, %v375_v27 }
  0x78   : > { %1406 = vmatprep.mubr.msk.f32.mxu0 %vm481_vm0, %v376_v28 }
  0x7b   : > { %1407 = vmatmul.mubr.msk.f32.gmra.mrb[14].mxu0 %vm481_vm0, %v376_v28 }
  0x7c   : > { %1408 = vmatprep.mubr.msk.f32.mxu0 %vm481_vm0, %v377_v29 }
  0x7f   : > { %1409 = vmatmul.mubr.msk.f32.gmra.mrb[16].mxu0 %vm481_vm0, %v377_v29 }
  0x80   : > { %1410 = vmatprep.mubr.msk.f32.mxu0 %vm481_vm0, %v378_v30 }
  0x83   : > { %1411 = vmatmul.mubr.msk.f32.gmra.mrb[18].mxu0 %vm481_vm0, %v378_v30 }
  0x84   : > { %1412 = vmatprep.mubr.msk.f32.mxu0 %vm481_vm0, %v379_v31 }
  0x87   : > { %1413 = vmatmul.mubr.msk.f32.gmra.mrb[20].mxu0 %vm481_vm0, %v379_v31 }
  0x88   : > { %1414 = vmatprep.mubr.msk.f32.mxu0 %vm481_vm0, %v380_v32 }
  0x8b   : > { %1415 = vmatmul.mubr.msk.f32.gmra.mrb[22].mxu0 %vm481_vm0, %v380_v32 }
  0x8c   : > { %1416 = vmatprep.mubr.msk.f32.mxu0 %vm481_vm0, %v381_v33 }
  0x8f   : > { %1417 = vmatmul.mubr.msk.f32.gmra.mrb[24].mxu0 %vm481_vm0, %v381_v33 }
  0x90   : > { %1418 = vmatprep.mubr.msk.f32.mxu0 %vm481_vm0, %v382_v34 }
  0x92   : > { %v404_v37 = vpop.permute.xlu0 %403  ;;  %v414_v46 = vpop.permute.xlu1 %413 }
  0x93   : > { %1419 = vmatmul.mubr.msk.f32.gmra.mrb[26].mxu0 %vm481_vm0, %v382_v34 }
  0x94   : > { %1420 = vmatprep.mubr.msk.f32.mxu0 %vm481_vm0, %v383_v35 }
  0x96   : > { %v409_v41 = vpop.permute.xlu0 %408  ;;  %v419_v57 = vpop.permute.xlu1 %418 }
  0x97   : > { %1421 = vmatmul.mubr.msk.f32.gmra.mrb[28].mxu0 %vm481_vm0, %v383_v35 }
  0x98   : > { %1422 = vmatprep.mubr.msk.f32.mxu0 %vm481_vm0, %v384_v36 }
  0x9a   : > { %v424_v9 = vpop.permute.xlu0 %423  ;;  %v429_v12 = vpop.permute.xlu1 %428 }
  0x9b   : > { %1423 = vmatmul.mubr.msk.f32.gmra.mrb[30].mxu0 %vm481_vm0, %v384_v36 }
  0x9e   : > { %v434_v4 = vpop.permute.xlu0 %433 }
  0x9f   : > { %v439_v26 = vpop.permute.xlu1 %438 }
 0x132   : > { %v692_v38 = vpop.f32.mrb[0].mxu0 }
 0x133   : > { %v694_v39 = vpop.f32.mrb[1].mxu0  ;;  %v693_v40 = vadd.f32 %v692_v38, %v404_v37 }
 0x134   : > { %v695_v42 = vadd.f32 %v694_v39, %v404_v37  ;;  %v444_v39 = vpop.permute.xlu0 %443 }
 0x135   : > { %v787_v48 = vmax.f32 %v693_v40, 0.0 }
 0x136   : > { %v698_v43 = vpop.f32.mrb[2].mxu0  ;;  %v788_v50 = vmax.f32 %v695_v42, 0.0  ;;  %v449_v42 = vpop.permute.xlu1 %448 }
 0x137   : > { %v699_v44 = vadd.f32 %v698_v43, %v409_v41  ;;  %v700_v45 = vpop.f32.mrb[3].mxu0 }
 0x138   : > { %v701_v47 = vadd.f32 %v700_v45, %v409_v41 }
 0x139   : > { %v789_v49 = vmax.f32 %v699_v44, 0.0 }
 0x13a   : > { %v790_v51 = vmax.f32 %v701_v47, 0.0  ;;  %v704_v52 = vpop.f32.mrb[4].mxu0 }
 0x13b   : > { %v706_v53 = vpop.f32.mrb[5].mxu0  ;;  %v827_v54 = vpack.c.bf16 %v789_v49, %v787_v48  ;;  %v705_v56 = vadd.f32 %v704_v52, %v414_v46 }
 0x13c   : > { %v828_v55 = vpack.c.bf16 %v790_v51, %v788_v50  ;;  %v707_v58 = vadd.f32 %v706_v53, %v414_v46 }
 0x13d   : > { %v791_v63 = vmax.f32 %v705_v56, 0.0 }
 0x13e   : > { %v710_v59 = vpop.f32.mrb[6].mxu0  ;;  %915 = vmatprep.subr.bf16.mxu1 %v828_v55  ;;  %v792_v3 = vmax.f32 %v707_v58, 0.0  ;;  %v454_v55 = vpop.permute.xlu0 %453 }
 0x13f   : > { %v711_v60 = vadd.f32 %v710_v59, %v419_v57  ;;  %v712_v61 = vpop.f32.mrb[7].mxu0  ;;  %916 = vmatpush1.bf16.msra.mxu1 %v827_v54  ;;  %v459_v58 = vpop.permute.xlu1 %458 }
 0x140   : > { %v713_v62 = vadd.f32 %v712_v61, %v419_v57 }
 0x141   : > { %v793_v0 = vmax.f32 %v711_v60, 0.0 }
 0x142   : > { %v794_v5 = vmax.f32 %v713_v62, 0.0  ;;  %v716_v6 = vpop.f32.mrb[8].mxu0 }
 0x143   : > { %v829_v7 = vpack.c.bf16 %v793_v0, %v791_v63  ;;  %v718_v8 = vpop.f32.mrb[9].mxu0  ;;  %v717_v11 = vadd.f32 %v716_v6, %v424_v9 }
 0x144   : > { %v830_v10 = vpack.c.bf16 %v794_v5, %v792_v3  ;;  %v719_v13 = vadd.f32 %v718_v8, %v424_v9 }
 0x145   : > { %v795_v18 = vmax.f32 %v717_v11, 0.0 }
 0x146   : > { %v722_v14 = vpop.f32.mrb[10].mxu0  ;;  %917 = vmatprep.subr.bf16.mxu1 %v830_v10  ;;  %v796_v20 = vmax.f32 %v719_v13, 0.0  ;;  %v464_v10 = vpop.permute.xlu0 %463 }
 0x147   : > { %v723_v15 = vadd.f32 %v722_v14, %v429_v12  ;;  %v724_v16 = vpop.f32.mrb[11].mxu0  ;;  %918 = vmatpush1.bf16.msra.mxu1 %v829_v7  ;;  %v469_v13 = vpop.permute.xlu1 %468 }
 0x148   : > { %v725_v17 = vadd.f32 %v724_v16, %v429_v12 }
 0x149   : > { %v797_v19 = vmax.f32 %v723_v15, 0.0 }
 0x14a   : > { %v798_v21 = vmax.f32 %v725_v17, 0.0  ;;  %v728_v22 = vpop.f32.mrb[12].mxu0 }
 0x14b   : > { %v831_v23 = vpack.c.bf16 %v797_v19, %v795_v18  ;;  %v730_v24 = vpop.f32.mrb[13].mxu0  ;;  %v729_v1 = vadd.f32 %v728_v22, %v434_v4 }
 0x14c   : > { %v832_v25 = vpack.c.bf16 %v798_v21, %v796_v20  ;;  %v731_v27 = vadd.f32 %v730_v24, %v434_v4 }
 0x14d   : > { %v799_v32 = vmax.f32 %v729_v1, 0.0 }
 0x14e   : > { %v734_v28 = vpop.f32.mrb[14].mxu0  ;;  %919 = vmatprep.subr.bf16.mxu1 %v832_v25  ;;  %v800_v34 = vmax.f32 %v731_v27, 0.0  ;;  %v474_v25 = vpop.permute.xlu0 %473 }
 0x14f   : > { %v735_v29 = vadd.f32 %v734_v28, %v439_v26  ;;  %v736_v30 = vpop.f32.mrb[15].mxu0  ;;  %920 = vmatpush1.bf16.msra.mxu1 %v831_v23  ;;  %v479_v27 = vpop.permute.xlu1 %478 }
 0x150   : > { %v737_v31 = vadd.f32 %v736_v30, %v439_v26 }
 0x151   : > { %v801_v33 = vmax.f32 %v735_v29, 0.0 }
 0x152   : > { %v802_v35 = vmax.f32 %v737_v31, 0.0  ;;  %v740_v36 = vpop.f32.mrb[16].mxu0 }
 0x153   : > { %v833_v37 = vpack.c.bf16 %v801_v33, %v799_v32  ;;  %v742_v38 = vpop.f32.mrb[17].mxu0  ;;  %v741_v41 = vadd.f32 %v740_v36, %v444_v39 }
 0x154   : > { %v834_v40 = vpack.c.bf16 %v802_v35, %v800_v34  ;;  %v743_v43 = vadd.f32 %v742_v38, %v444_v39  ;;  %v1515_v39 = vld [vmem:[%s2029_s3] sm:$0xff]  }
 0x155   : > { %v803_v48 = vmax.f32 %v741_v41, 0.0  ;;  %v1517_v41 = vld [vmem:[%s2029_s3 + $0x10] sm:$0xff]  }
 0x156   : > { %v746_v44 = vpop.f32.mrb[18].mxu0  ;;  %921 = vmatprep.subr.bf16.mxu1 %v834_v40  ;;  %v804_v50 = vmax.f32 %v743_v43, 0.0  ;;  %v1516_v40 = vld [vmem:[%s2029_s3 + $0x8] sm:$0xff]   ;;  %v854_v43 = vpop.permute.xlu0 %853 }
 0x157   : > { %v747_v45 = vadd.f32 %v746_v44, %v449_v42  ;;  %v748_v46 = vpop.f32.mrb[19].mxu0  ;;  %922 = vmatpush1.bf16.msra.mxu1 %v833_v37 }
 0x158   : > { %v749_v47 = vadd.f32 %v748_v46, %v449_v42  ;;  %v1518_v42 = vld [vmem:[%s2029_s3 + $0x18] sm:$0xff]  }
 0x159   : > { %v805_v49 = vmax.f32 %v747_v45, 0.0 }
 0x15a   : > { %v806_v51 = vmax.f32 %v749_v47, 0.0  ;;  %v752_v52 = vpop.f32.mrb[20].mxu0  ;;  %v859_v47 = vpop.permute.xlu1 %858 }
 0x15b   : > { %v835_v53 = vpack.c.bf16 %v805_v49, %v803_v48  ;;  %v754_v54 = vpop.f32.mrb[21].mxu0  ;;  %v753_v57 = vadd.f32 %v752_v52, %v454_v55 }
 0x15c   : > { %v836_v56 = vpack.c.bf16 %v806_v51, %v804_v50  ;;  %v755_v59 = vadd.f32 %v754_v54, %v454_v55 }
 0x15d   : > { %v807_v0 = vmax.f32 %v753_v57, 0.0 }
 0x15e   : > { %v758_v60 = vpop.f32.mrb[22].mxu0  ;;  %923 = vmatprep.subr.bf16.mxu1 %v836_v56  ;;  %v808_v5 = vmax.f32 %v755_v59, 0.0 }
 0x15f   : > { %v759_v61 = vadd.f32 %v758_v60, %v459_v58  ;;  %v760_v62 = vpop.f32.mrb[23].mxu0  ;;  %924 = vmatpush1.bf16.msra.mxu1 %v835_v53 }
 0x160   : > { %v761_v63 = vadd.f32 %v760_v62, %v459_v58  ;;  %v864_v58 = vpop.permute.xlu0 %863 }
 0x161   : > { %v809_v3 = vmax.f32 %v759_v61, 0.0 }
 0x162   : > { %v810_v6 = vmax.f32 %v761_v63, 0.0  ;;  %v764_v7 = vpop.f32.mrb[24].mxu0  ;;  %v869_v63 = vpop.permute.xlu1 %868 }
 0x163   : > { %v837_v8 = vpack.c.bf16 %v809_v3, %v807_v0  ;;  %v766_v9 = vpop.f32.mrb[25].mxu0  ;;  %v765_v12 = vadd.f32 %v764_v7, %v464_v10 }
 0x164   : > { %v838_v11 = vpack.c.bf16 %v810_v6, %v808_v5  ;;  %v767_v14 = vadd.f32 %v766_v9, %v464_v10 }
 0x165   : > { %v811_v19 = vmax.f32 %v765_v12, 0.0 }
 0x166   : > { %v770_v15 = vpop.f32.mrb[26].mxu0  ;;  %925 = vmatprep.subr.bf16.mxu1 %v838_v11  ;;  %v812_v21 = vmax.f32 %v767_v14, 0.0 }
 0x167   : > { %v771_v16 = vadd.f32 %v770_v15, %v469_v13  ;;  %v772_v17 = vpop.f32.mrb[27].mxu0  ;;  %926 = vmatpush1.bf16.msra.mxu1 %v837_v8 }
 0x168   : > { %v773_v18 = vadd.f32 %v772_v17, %v469_v13  ;;  %v874_v13 = vpop.permute.xlu0 %873 }
 0x169   : > { %v813_v20 = vmax.f32 %v771_v16, 0.0 }
 0x16a   : > { %v814_v22 = vmax.f32 %v773_v18, 0.0  ;;  %v776_v23 = vpop.f32.mrb[28].mxu0  ;;  %v879_v18 = vpop.permute.xlu1 %878 }
 0x16b   : > { %v839_v24 = vpack.c.bf16 %v813_v20, %v811_v19  ;;  %v778_v4 = vpop.f32.mrb[29].mxu0  ;;  %v777_v26 = vadd.f32 %v776_v23, %v474_v25 }
 0x16c   : > { %v840_v1 = vpack.c.bf16 %v814_v22, %v812_v21  ;;  %v779_v28 = vadd.f32 %v778_v4, %v474_v25 }
 0x16d   : > { %v815_v33 = vmax.f32 %v777_v26, 0.0 }
 0x16e   : > { %v782_v29 = vpop.f32.mrb[30].mxu0  ;;  %927 = vmatprep.subr.bf16.mxu1 %v840_v1  ;;  %v816_v35 = vmax.f32 %v779_v28, 0.0 }
 0x16f   : > { %v783_v30 = vadd.f32 %v782_v29, %v479_v27  ;;  %v784_v31 = vpop.f32.mrb[31].mxu0  ;;  %928 = vmatpush1.bf16.msra.mxu1 %v839_v24 }
 0x170   : > { %v785_v32 = vadd.f32 %v784_v31, %v479_v27  ;;  %v884_v27 = vpop.permute.xlu0 %883 }
 0x171   : > { %v817_v34 = vmax.f32 %v783_v30, 0.0 }
 0x172   : > { %v818_v36 = vmax.f32 %v785_v32, 0.0  ;;  %v889_v32 = vpop.permute.xlu1 %888 }
 0x173   : > { %v841_v37 = vpack.c.bf16 %v817_v34, %v815_v33 }
 0x174   : > { %v842_v38 = vpack.c.bf16 %v818_v36, %v816_v35 }
 0x176   : > { %929 = vmatprep.subr.bf16.mxu1 %v842_v38 }
 0x177   : > { %930 = vmatpush1.bf16.msra.mxu1 %v841_v37 }
 0x17a   : > { %948 = vmatmul.mubr.bf16.vlgmr.msra.gmra.mrb[0].mxu1 %v1515_v39 }
 0x17b   : > { %957 = vmatprep.mubr.bf16.mxu1 %v1593_v2 }
 0x182   : > { %958 = vmatmul.mubr.bf16.gmra.mrb[4].mxu1 %v1516_v40 }
 0x183   : > { %967 = vmatprep.mubr.bf16.mxu1 %v1593_v2 }
 0x18a   : > { %968 = vmatmul.mubr.bf16.gmra.mrb[8].mxu1 %v1517_v41 }
 0x18b   : > { %977 = vmatprep.mubr.bf16.mxu1 %v1593_v2 }
 0x192   : > { %978 = vmatmul.mubr.bf16.gmra.mrb[12].mxu1 %v1518_v42 }
 0x193   : > { %1089 = vmatprep.mubr.bf16.mxu1 %v1593_v2 }
 0x24d   : > { %v949_v44 = vpop.f32.mrb[0].mxu1 }
 0x24e   : > { %v950_v45 = vadd.f32 %v949_v44, %v854_v43  ;;  %v951_v46 = vpop.f32.mrb[1].mxu1  ;;  %v1519_v44 = vld [vmem:[%s2031_s5] sm:$0xff]  }
 0x24f   : > { %v952_v48 = vadd.f32 %v951_v46, %v854_v43  ;;  %v953_v49 = vpop.f32.mrb[2].mxu1  ;;  %v1023_v46 = vpop.permute.xlu0 %1022 }
 0x250   : > { %v954_v50 = vadd.f32 %v953_v49, %v859_v47  ;;  %v955_v51 = vpop.f32.mrb[3].mxu1  ;;  %v988_v53 = vmax.f32 %v950_v45, 0.0  ;;  %v1520_v45 = vld [vmem:[%s2031_s5 + $0x8] sm:$0xff]  }
 0x251   : > { %v956_v52 = vadd.f32 %v955_v51, %v859_v47  ;;  %v989_v55 = vmax.f32 %v952_v48, 0.0  ;;  %v1028_v47 = vpop.permute.xlu1 %1027 }
 0x252   : > { %v990_v54 = vmax.f32 %v954_v50, 0.0 }
 0x253   : > { %v991_v56 = vmax.f32 %v956_v52, 0.0  ;;  %v1033_v48 = vpop.permute.xlu0 %1032 }
 0x254   : > { %v1008_v57 = vpack.c.bf16 %v990_v54, %v988_v53 }
 0x255   : > { %v1009_v59 = vpack.c.bf16 %v991_v56, %v989_v55  ;;  %v959_v60 = vpop.f32.mrb[4].mxu1  ;;  %v1038_v49 = vpop.permute.xlu1 %1037 }
 0x256   : > { %v960_v61 = vadd.f32 %v959_v60, %v864_v58  ;;  %v961_v62 = vpop.f32.mrb[5].mxu1 }
 0x257   : > { %v962_v0 = vadd.f32 %v961_v62, %v864_v58  ;;  %v963_v3 = vpop.f32.mrb[6].mxu1  ;;  %1057 = vmatprep.subr.bf16.mxu1 %v1009_v59  ;;  %v1125_v60 = vpop.permute.xlu0 %1124 }
 0x258   : > { %v964_v5 = vadd.f32 %v963_v3, %v869_v63  ;;  %v965_v6 = vpop.f32.mrb[7].mxu1  ;;  %1058 = vmatpush1.bf16.msra.mxu1 %v1008_v57  ;;  %v992_v8 = vmax.f32 %v960_v61, 0.0 }
 0x259   : > { %v966_v7 = vadd.f32 %v965_v6, %v869_v63  ;;  %v993_v10 = vmax.f32 %v962_v0, 0.0  ;;  %v1130_v61 = vpop.permute.xlu1 %1129 }
 0x25a   : > { %v994_v9 = vmax.f32 %v964_v5, 0.0 }
 0x25b   : > { %v995_v11 = vmax.f32 %v966_v7, 0.0 }
 0x25c   : > { %v1010_v12 = vpack.c.bf16 %v994_v9, %v992_v8 }
 0x25d   : > { %v1011_v14 = vpack.c.bf16 %v995_v11, %v993_v10  ;;  %v969_v15 = vpop.f32.mrb[8].mxu1 }
 0x25e   : > { %v970_v16 = vadd.f32 %v969_v15, %v874_v13  ;;  %v971_v17 = vpop.f32.mrb[9].mxu1 }
 0x25f   : > { %v972_v19 = vadd.f32 %v971_v17, %v874_v13  ;;  %v973_v20 = vpop.f32.mrb[10].mxu1  ;;  %1059 = vmatprep.subr.bf16.mxu1 %v1011_v14 }
 0x260   : > { %v974_v21 = vadd.f32 %v973_v20, %v879_v18  ;;  %v975_v22 = vpop.f32.mrb[11].mxu1  ;;  %1060 = vmatpush1.bf16.msra.mxu1 %v1010_v12  ;;  %v996_v24 = vmax.f32 %v970_v16, 0.0  ;;  %v1135_v16 = vpop.permute.xlu0 %1134 }
 0x261   : > { %v976_v23 = vadd.f32 %v975_v22, %v879_v18  ;;  %v997_v25 = vmax.f32 %v972_v19, 0.0 }
 0x262   : > { %v998_v4 = vmax.f32 %v974_v21, 0.0  ;;  %v1140_v21 = vpop.permute.xlu1 %1139 }
 0x263   : > { %v999_v1 = vmax.f32 %v976_v23, 0.0 }
 0x264   : > { %v1012_v26 = vpack.c.bf16 %v998_v4, %v996_v24 }
 0x265   : > { %v1013_v28 = vpack.c.bf16 %v999_v1, %v997_v25  ;;  %v979_v29 = vpop.f32.mrb[12].mxu1 }
 0x266   : > { %v980_v30 = vadd.f32 %v979_v29, %v884_v27  ;;  %v981_v31 = vpop.f32.mrb[13].mxu1 }
 0x267   : > { %v982_v33 = vadd.f32 %v981_v31, %v884_v27  ;;  %v983_v34 = vpop.f32.mrb[14].mxu1  ;;  %1061 = vmatprep.subr.bf16.mxu1 %v1013_v28 }
 0x268   : > { %v984_v35 = vadd.f32 %v983_v34, %v889_v32  ;;  %v985_v36 = vpop.f32.mrb[15].mxu1  ;;  %1062 = vmatpush1.bf16.msra.mxu1 %v1012_v26  ;;  %v1000_v38 = vmax.f32 %v980_v30, 0.0  ;;  %v1174_v26 = vlaneseq }
 0x269   : > { %v986_v37 = vadd.f32 %v985_v36, %v889_v32  ;;  %v1001_v40 = vmax.f32 %v982_v33, 0.0 }
 0x26a   : > { %v1002_v39 = vmax.f32 %v984_v35, 0.0  ;;  %v1175_v31 = vshrl.u32 %v1174_v26, 7  ;;  %vm1212_vm3 = vcmp.lt.s32.totalorder %v1174_v26, 256 }
 0x26b   : > { %v1003_v41 = vmax.f32 %v986_v37, 0.0 }
 0x26c   : > { %v1014_v42 = vpack.c.bf16 %v1002_v39, %v1000_v38  ;;  %v1176_v36 = vsub.s32 0, %v1175_v31  ;;  %v1172_v38 = vpop.permute.xlu0 %1171 }
 0x26d   : > { %v1015_v43 = vpack.c.bf16 %v1003_v41, %v1001_v40 }
 0x26f   : > { %1063 = vmatprep.subr.bf16.mxu1 %v1015_v43 }
 0x270   : > { %1064 = vmatpush1.bf16.msra.mxu1 %v1014_v42  ;;  %v1177_v42 = vrot.slane %v1172_v38, %v1176_v36 }
 0x273   : > { %1350 = vmatmul.mubr.msk.bf16.vlgmr.msra.gmra.mrb[16].mxu1 %vm1050_vm2, %v1519_v44 }
 0x274   : > { %1099 = vmatprep.mubr.bf16.mxu1 %v1593_v2 }
 0x27b   : > { %1351 = vmatmul.mubr.msk.bf16.gmra.mrb[20].mxu1 %vm1050_vm2, %v1520_v45 }
 0x346   : > { %v1091_v50 = vpop.f32.mrb[16].mxu1 }
 0x347   : > { %v1092_v51 = vadd.f32 %v1091_v50, %v1023_v46  ;;  %v1093_v52 = vpop.f32.mrb[17].mxu1 }
 0x348   : > { %v1094_v53 = vadd.f32 %v1093_v52, %v1023_v46  ;;  %v1095_v54 = vpop.f32.mrb[18].mxu1 }
 0x349   : > { %v1110_v55 = vmax.f32 %v1092_v51, 0.0  ;;  %v1096_v56 = vadd.f32 %v1095_v54, %v1028_v47  ;;  %v1097_v57 = vpop.f32.mrb[19].mxu1 }
 0x34a   : > { %v1111_v58 = vmax.f32 %v1094_v53, 0.0  ;;  %v1098_v59 = vadd.f32 %v1097_v57, %v1028_v47  ;;  %v1594_v53 = vmov 1966171168  }
 0x34b   : > { %v1112_v2 = vmax.f32 %v1096_v56, 0.0  ;;  %v1142_v63 = vmul.f32 %v1125_v60, %v1110_v55  ;;  %v1196_v54 = vunpack.c.l.s4 %v1594_v53 }
 0x34c   : > { %v1113_v62 = vmax.f32 %v1098_v59, 0.0  ;;  %v1143_v3 = vmul.f32 %v1125_v60, %v1111_v58 }
 0x34d   : > { %v1144_v0 = vmul.f32 %v1130_v61, %v1112_v2  ;;  %v1197_v55 = vunpack.c.0.s8 %v1196_v54 }
 0x34e   : > { %v1145_v5 = vmul.f32 %v1130_v61, %v1113_v62  ;;  %v1101_v6 = vpop.f32.mrb[20].mxu1 }
 0x34f   : > { %v1150_v7 = vadd.f32 %v1144_v0, %v1142_v63  ;;  %v1102_v8 = vadd.f32 %v1101_v6, %v1033_v48  ;;  %v1103_v9 = vpop.f32.mrb[21].mxu1  ;;  %v1200_v57 = vsub.s32 %v1197_v55, %v1175_v31 }
 0x350   : > { %v1159_v10 = vadd.f32 %v1145_v5, %v1143_v3  ;;  %v1104_v11 = vadd.f32 %v1103_v9, %v1033_v48  ;;  %v1105_v12 = vpop.f32.mrb[22].mxu1 }
 0x351   : > { %v1114_v13 = vmax.f32 %v1102_v8, 0.0  ;;  %v1106_v14 = vadd.f32 %v1105_v12, %v1038_v49  ;;  %v1107_v15 = vpop.f32.mrb[23].mxu1 }
 0x352   : > { %v1115_v17 = vmax.f32 %v1104_v11, 0.0  ;;  %v1108_v18 = vadd.f32 %v1107_v15, %v1038_v49 }
 0x353   : > { %v1146_v19 = vmul.f32 %v1135_v16, %v1114_v13  ;;  %v1116_v20 = vmax.f32 %v1106_v14, 0.0 }
 0x354   : > { %v1147_v22 = vmul.f32 %v1135_v16, %v1115_v17  ;;  %v1117_v23 = vmax.f32 %v1108_v18, 0.0 }
 0x355   : > { %v1151_v24 = vadd.f32 %v1150_v7, %v1146_v19  ;;  %v1148_v4 = vmul.f32 %v1140_v21, %v1116_v20 }
 0x356   : > { %v1160_v25 = vadd.f32 %v1159_v10, %v1147_v22  ;;  %v1149_v1 = vmul.f32 %v1140_v21, %v1117_v23 }
 0x357   : > { %v1152_v27 = vadd.f32 %v1151_v24, %v1148_v4 }
 0x358   : > { %v1161_v28 = vadd.f32 %v1160_v25, %v1149_v1 }
 0x359   : > { %v1153_v29 = vrot.slane %v1152_v27, 4 }
 0x35a   : > { %v1162_v30 = vrot.slane %v1161_v28, 4 }
 0x35b   : > { %v1154_v32 = vadd.f32 %v1153_v29, %v1152_v27 }
 0x35c   : > { %v1163_v33 = vadd.f32 %v1162_v30, %v1161_v28 }
 0x35d   : > { %v1155_v34 = vrot.slane %v1154_v32, 2 }
 0x35e   : > { %v1164_v35 = vrot.slane %v1163_v33, 2 }
 0x35f   : > { %v1156_v37 = vadd.f32 %v1155_v34, %v1154_v32 }
 0x360   : > { %v1165_v39 = vadd.f32 %v1164_v35, %v1163_v33 }
 0x361   : > { %v1157_v40 = vrot.slane %v1156_v37, 1 }
 0x362   : > { %v1166_v41 = vrot.slane %v1165_v39, 1 }
 0x363   : > { %v1158_v43 = vadd.f32 %v1157_v40, %v1156_v37 }
 0x364   : > { %v1167_v44 = vadd.f32 %v1166_v41, %v1165_v39 }
 0x365   : > { %v1178_v45 = vadd.f32 %v1177_v42, %v1158_v43 }
 0x366   : > { %v1179_v46 = vadd.f32 %v1177_v42, %v1167_v44 }
 0x367   : > { %v1352_v47 = vmul.f32 -1.442695, %v1178_v45 }
 0x368   : > { %v1353_v48 = vmul.f32 -1.442695, %v1179_v46 }
 0x369   : > { %1521 = vpow2.f32 %v1352_v47 }
 0x36a   : > { %1523 = vpow2.f32 %v1353_v48 }
 0x373   : > { %v1522_v49 = vpop.eup %1521 }
 0x374   : > { %v1524_v50 = vpop.eup %1523  ;;  %v1186_v51 = vadd.f32 1.0, %v1522_v49 }
 0x375   : > { %v1187_v52 = vadd.f32 1.0, %v1524_v50 }
 0x376   : > { %1525 = vrcp.f32 %v1186_v51 }
 0x377   : > { %1527 = vrcp.f32 %v1187_v52 }
 0x380   : > { %v1526_v56 = vpop.eup %1525 }
 0x381   : > { %v1528_v58 = vpop.eup %1527 }
 0x382   : > { %v1194_v59 = vcombine.low %v1526_v56, %v1528_v58 }
 0x384   : > { %v1201_v2 = vrot.slane %v1194_v59, %v1200_v57 }
 0x386   : > { %v1208_v60 = vrot.slane %v1201_v2, %v1200_v57 }
 0x388   : > { %1214 = vst.msk [vmem:[%s328_s25] sm:$0x3] %vm1212_vm3, %v1208_v60 }
 0x389   : > { %1542 = shalt.err (!%p1539_p3)
}
 0x38a   : > { %s1543_s22 = scalar_lea.hbm %s1984_s10, 32  ;;  %s1547_s24 = scalar_lea.hbm %s2035_s9, 64 }
 0x38b   : > { %p1544_p4 = scmp.ne.s32.totalorder %s1984_s10, %s1543_s22  ;;  %p1548_p9 = scmp.lt.u32.totalorder %s1984_s10, %s2035_s9 }
 0x38c   : > { %p1549_p10 = scmp.lt.u32.totalorder %s1547_s24, %s1543_s22  ;;  %p1551_p12 = scmp.lt.u32.totalorder %s1543_s22, %s1984_s10 }
 0x38d   : > { %p1545_p7 = pnand %p1544_p4, %p1684_p5 }
 0x38e   : > { %p1550_p11 = por %p1549_p10, %p1548_p9 }
 0x38f   : > { %p1546_p8 = pneg %p1545_p7 }
 0x390   : > { %p1552_p13 = por %p1551_p12, %p1550_p11 }
 0x392   : > { %p1553_p0 = pnand %p1552_p13, %p1546_p8 }
 0x394   : > { %1556 = shalt.err (!%p1553_p0)
}
 0x395   : > { %1472 = dma.vmem_to_hbm [thread:$0]  (%p1684_p5), %s1986_s26, 32, %s1984_s10, %s1216_s29  }
 0x396 PF: > { %p1478_p1 = scmp.ge.s32.totalorder %s1591_s14, 2  ;;  %s1242_s28 = sand.u32 1, %s1579_s11  }
 0x397   : > { %s1243_s30 = scalar_lea.sflag [#allocation4], %s1242_s28 }
 0x398   : > { %p1475_p2 = pnand %p1478_p1, %p1688_p6 }
 0x39a   : > { %1574 = dma.done.wait (!%p1475_p2), %s1243_s30, 32  }
 0x39b   : > { %1576 = vsyncadd (!%p1475_p2), %s1243_s30, 4294967264  ;;  %p21_p3 = scmp.ge.s32.totalorder %s1672_s16, 4   ;;  %s2040_s11 = smov %s1583_s12 }
 0x39c   : > { %s2041_s12 = smov %s1587_s13  ;;  %s2042_s13 = smov %s1682_s19 }
 0x39d   : > { %s2043_s14 = smov %s1672_s16  ;;  %23 = sbr.rel (!%p21_p3) target bundleno = 6 (0x6), region = 91 }
 0x3a4   :  { %1248 = vsyncpa [#allocation4], 1 }
 0x3a5   :  { %1250 = vsyncpa [#allocation4 + $0x1], 1 }

</bundles_post_ra>
